<compile_context>
chip_gen: v6e
topology: v6e:2x2x1
jax: 0.10.0
libtpu: 0.0.40
codegen_flags: <defaults>
</compile_context>

<pallas_src>
import functools

import jax
import jax.numpy as jnp
from jax import lax
from jax.experimental import pallas as pl
from jax.experimental.pallas import tpu as pltpu


def _basic_block_kernel(x_ref, w_ref, scale_ref, shift_ref, wpos_ref, o_ref,
                        abuf, col, *, H, W, Cin, Cout, M):
    """One batch element per grid step.

    x_ref:     (1, Cin, H*W)       input (channels on sublanes, spatial on lanes)
    w_ref:     (Cout, 9*Cin)       conv weight, K ordered (kh, kw, ci)
    scale_ref: (Cin, 1)            fused BN scale = gamma / sqrt(var + eps), f32
    shift_ref: (Cin, 1)            fused BN shift = beta - mean * scale, f32
    wpos_ref:  (1, H*W)            column index (w) of each flattened position
    o_ref:     (1, Cin+Cout, H*W)  output block: [x ; conv(relu(bn(x)))]
    abuf:      (Cin, M + H*W + M)  VMEM scratch: margin-padded flat activation
    col:       (9*Cin, H*W)        VMEM scratch: im2col buffer
    """
    HW = H * W

    x = x_ref[0]                                          # (Cin, HW)

    # Concat passthrough: channels [0, Cin) of the output are the raw input.
    o_ref[0, 0:Cin, :] = x.astype(o_ref.dtype)

    # BN (inference, fused) + ReLU in f32.
    a = jnp.maximum(x.astype(jnp.float32) * scale_ref[...] + shift_ref[...], 0.0)

    # Margin-padded flattened activation.  The zero margins supply the top /
    # bottom SAME-padding rows.  Margins are 1 aligned vreg-row each, so re-zero
    # them every step (stays correct even when the "parallel" grid axis is split
    # across TensorCores, where per-core scratch would defeat a zero-once guard).
    abuf[:, 0:M] = jnp.zeros((Cin, M), abuf.dtype)
    abuf[:, M + HW:M + HW + M] = jnp.zeros((Cin, M), abuf.dtype)
    abuf[:, M:M + HW] = a.astype(abuf.dtype)              # aligned, lane-dense

    # Column masks for taps that cross a row boundary in the flat layout
    # (left / right SAME-padding).  Hoisted out of the tap loop; only 6 of the
    # 9 taps need a select at all.
    wpos = wpos_ref[...]                                  # (1, HW) int32
    not_first_col = wpos > 0
    not_last_col = wpos < (W - 1)

    # im2col: nine static lane-offset loads, masked, packed into `col`.
    for kh in range(3):
        for kw in range(3):
            t = kh * 3 + kw
            delta = (kh - 1) * W + (kw - 1)
            s = abuf[:, M + delta:M + delta + HW]         # (Cin, HW)
            if kw == 0:
                s = jnp.where(not_first_col, s, jnp.zeros_like(s))
            elif kw == 2:
                s = jnp.where(not_last_col, s, jnp.zeros_like(s))
            col[t * Cin:(t + 1) * Cin, :] = s

    # Single fused MXU matmul over K = 9*Cin, lane-dense (Cout, H*W) result.
    acc = jnp.dot(w_ref[...], col[...], preferred_element_type=jnp.float32)
    o_ref[0, Cin:Cin + Cout, :] = acc.astype(o_ref.dtype)


def basic_block_forward(x_nchw, conv_w_oihw, bn_gamma, bn_beta, bn_mean, bn_var,
                        eps=1e-5):
    """Matches BasicBlock.forward (eval mode, droprate=0): cat([x, conv(relu(bn(x)))], 1)."""
    N, Cin, H, W = x_nchw.shape
    Cout = conv_w_oihw.shape[0]
    HW = H * W
    Ctot = Cin + Cout
    M = 128                              # lane-aligned halo margin (needs >= W + 1)

    # Free row-major reshape: spatial axis onto lanes.  No transposes.
    x_flat = x_nchw.reshape(N, Cin, HW)

    # Weight (Cout, Cin, 3, 3) -> (Cout, 9*Cin) with K ordered (kh, kw, ci),
    # matching the im2col row order.  One-time, tiny.
    w2d = jnp.transpose(conv_w_oihw, (0, 2, 3, 1)).reshape(Cout, 9 * Cin)

    # Fused inference-mode BN parameters.
    scale = (bn_gamma / jnp.sqrt(bn_var + eps)).astype(jnp.float32)
    shift = (bn_beta - bn_mean * scale).astype(jnp.float32)
    scale = scale.reshape(Cin, 1)
    shift = shift.reshape(Cin, 1)

    # Static column-index vector (w coordinate of each flattened position).
    # Passed as a tiny (1, HW) int32 input: its constant index_map keeps it
    # resident in VMEM across grid steps (cheaper/safer than in-kernel iota+mod).
    wpos = (jnp.arange(HW, dtype=jnp.int32) % W).reshape(1, HW)

    cdt = conv_w_oihw.dtype              # MXU operand dtype (bf16-friendly)

    kernel = functools.partial(_basic_block_kernel,
                               H=H, W=W, Cin=Cin, Cout=Cout, M=M)

    itemsize = jnp.dtype(x_nchw.dtype).itemsize
    cost = pl.CostEstimate(
        flops=2 * N * Cout * 9 * Cin * HW,
        transcendentals=0,
        bytes_accessed=(N * Cin * HW * itemsize          # input
                        + N * Ctot * HW * itemsize       # output (incl. concat copy)
                        + Cout * 9 * Cin * jnp.dtype(cdt).itemsize),
    )

    out_flat = pl.pallas_call(
        kernel,
        out_shape=jax.ShapeDtypeStruct((N, Ctot, HW), x_nchw.dtype),
        grid_spec=pltpu.PrefetchScalarGridSpec(
            num_scalar_prefetch=0,
            grid=(N,),
            in_specs=[
                pl.BlockSpec((1, Cin, HW), lambda n: (n, 0, 0)),
                pl.BlockSpec((Cout, 9 * Cin), lambda n: (0, 0)),
                pl.BlockSpec((Cin, 1), lambda n: (0, 0)),
                pl.BlockSpec((Cin, 1), lambda n: (0, 0)),
                pl.BlockSpec((1, HW), lambda n: (0, 0)),
            ],
            out_specs=pl.BlockSpec((1, Ctot, HW), lambda n: (n, 0, 0)),
            scratch_shapes=[
                pltpu.VMEM((Cin, M + HW + M), cdt),   # padded flat activation
                pltpu.VMEM((9 * Cin, HW), cdt),       # im2col buffer
            ],
        ),
        compiler_params=pltpu.CompilerParams(
            dimension_semantics=("parallel",)),
        cost_estimate=cost,
    )(x_flat, w2d, scale, shift, wpos)

    # Free reshape back to NCHW: (N, Cin+Cout, H, W).
    return out_flat.reshape(N, Ctot, H, W)


def _reference(x_nchw, conv_w_oihw, g, b, m, v, eps=1e-5):
    scale = g / jnp.sqrt(v + eps)
    shift = b - m * scale
    a = jnp.maximum(
        x_nchw * scale[None, :, None, None] + shift[None, :, None, None], 0.0)
    conv = lax.conv_general_dilated(
        a, conv_w_oihw, window_strides=(1, 1), padding="SAME",
        dimension_numbers=("NCHW", "OIHW", "NCHW"))
    return jnp.concatenate([x_nchw, conv], axis=1)


if __name__ == "__main__":
    N, Cin, H, W = 2, 4, 16, 16
    Cout = 8

    key = jax.random.PRNGKey(0)
    k_x, k_w, k_g, k_b, k_m, k_v = jax.random.split(key, 6)

    x = jax.random.normal(k_x, (N, Cin, H, W), dtype=jnp.float32)
    conv_w = jax.random.normal(k_w, (Cout, Cin, 3, 3), dtype=jnp.float32) * 0.1
    bn_gamma = 1.0 + 0.1 * jax.random.normal(k_g, (Cin,), dtype=jnp.float32)
    bn_beta = 0.1 * jax.random.normal(k_b, (Cin,), dtype=jnp.float32)
    bn_mean = 0.1 * jax.random.normal(k_m, (Cin,), dtype=jnp.float32)
    bn_var = jnp.abs(jax.random.normal(k_v, (Cin,), dtype=jnp.float32)) + 0.5

    out = basic_block_forward(x, conv_w, bn_gamma, bn_beta, bn_mean, bn_var)
    out = jax.block_until_ready(out)

    ref = _reference(x, conv_w, bn_gamma, bn_beta, bn_mean, bn_var)
    assert out.shape == (N, Cin + Cout, H, W), out.shape
    max_err = float(jnp.max(jnp.abs(out - ref)))
    assert jnp.allclose(out, ref, atol=1e-4, rtol=1e-4), max_err

    print("KERNEL_OK")
</pallas_src>

<mosaic_0001>
module attributes {stable_mosaic.version = 11 : i64} {
  func.func @_basic_block_kernel(%arg0: i32, %arg1: memref<1x4x256xf32, #tpu.memory_space<vmem>>, %arg2: memref<8x36xf32, #tpu.memory_space<vmem>>, %arg3: memref<4x1xf32, #tpu.memory_space<vmem>>, %arg4: memref<4x1xf32, #tpu.memory_space<vmem>>, %arg5: memref<1x256xi32, #tpu.memory_space<vmem>>, %arg6: memref<1x12x256xf32, #tpu.memory_space<vmem>>, %arg7: memref<4x512xf32, #tpu.memory_space<vmem>>, %arg8: memref<36x256xf32, #tpu.memory_space<vmem>>) attributes {dimension_semantics = [#tpu.dimension_semantics<parallel>], iteration_bounds = array<i64: 2>, scalar_prefetch = 0 : i64, scratch_operands = 2 : i64, tpu.core_type = #tpu.core_type<tc>, window_params = [{transform_indices = @transform_0, window_bounds = array<i64: 1, 4, 256>}, {pipeline_mode = #tpu.pipeline_mode<synchronous>, transform_indices = @transform_1, window_bounds = array<i64: 8, 36>}, {pipeline_mode = #tpu.pipeline_mode<synchronous>, transform_indices = @transform_2, window_bounds = array<i64: 4, 1>}, {pipeline_mode = #tpu.pipeline_mode<synchronous>, transform_indices = @transform_3, window_bounds = array<i64: 4, 1>}, {pipeline_mode = #tpu.pipeline_mode<synchronous>, transform_indices = @transform_4, window_bounds = array<i64: 1, 256>}, {transform_indices = @transform_5, window_bounds = array<i64: 1, 12, 256>}]} {
    %c0 = arith.constant 0 : index
    %c0_0 = arith.constant 0 : index
    %c0_1 = arith.constant 0 : index
    %0 = vector.load %arg1[%c0, %c0_0, %c0_1] : memref<1x4x256xf32, #tpu.memory_space<vmem>>, vector<1x4x256xf32>
    %1 = vector.shape_cast %0 : vector<1x4x256xf32> to vector<4x256xf32>
    %c0_2 = arith.constant 0 : index
    %c0_3 = arith.constant 0 : index
    %c0_4 = arith.constant 0 : index
    %2 = vector.load %arg6[%c0_2, %c0_3, %c0_4] : memref<1x12x256xf32, #tpu.memory_space<vmem>>, vector<1x4x256xf32>
    %3 = vector.shape_cast %2 : vector<1x4x256xf32> to vector<4x256xf32>
    %4 = vector.shape_cast %1 : vector<4x256xf32> to vector<1x4x256xf32>
    tpu.vector_store %arg6[%c0_2, %c0_3, %c0_4], %4 {strides = array<i32>} : memref<1x12x256xf32, #tpu.memory_space<vmem>>, vector<1x4x256xf32>,
    %c0_5 = arith.constant 0 : index
    %c0_6 = arith.constant 0 : index
    %5 = vector.load %arg3[%c0_5, %c0_6] : memref<4x1xf32, #tpu.memory_space<vmem>>, vector<4x1xf32>
    %6 = vector.broadcast %5 : vector<4x1xf32> to vector<4x256xf32>
    %7 = arith.mulf %1, %6 : vector<4x256xf32>
    %c0_7 = arith.constant 0 : index
    %c0_8 = arith.constant 0 : index
    %8 = vector.load %arg4[%c0_7, %c0_8] : memref<4x1xf32, #tpu.memory_space<vmem>>, vector<4x1xf32>
    %9 = vector.broadcast %8 : vector<4x1xf32> to vector<4x256xf32>
    %10 = arith.addf %7, %9 : vector<4x256xf32>
    %cst = arith.constant 0.000000e+00 : f32
    %11 = vector.broadcast %cst : f32 to vector<4x256xf32>
    %12 = arith.maximumf %10, %11 : vector<4x256xf32>
    %cst_9 = arith.constant 0.000000e+00 : f32
    %13 = vector.broadcast %cst_9 : f32 to vector<4x128xf32>
    %c0_10 = arith.constant 0 : index
    %c0_11 = arith.constant 0 : index
    %14 = vector.load %arg7[%c0_10, %c0_11] : memref<4x512xf32, #tpu.memory_space<vmem>>, vector<4x128xf32>
    tpu.vector_store %arg7[%c0_10, %c0_11], %13 {strides = array<i32>} : memref<4x512xf32, #tpu.memory_space<vmem>>, vector<4x128xf32>,
    %cst_12 = arith.constant 0.000000e+00 : f32
    %15 = vector.broadcast %cst_12 : f32 to vector<4x128xf32>
    %c0_13 = arith.constant 0 : index
    %c384 = arith.constant 384 : index
    %16 = vector.load %arg7[%c0_13, %c384] : memref<4x512xf32, #tpu.memory_space<vmem>>, vector<4x128xf32>
    tpu.vector_store %arg7[%c0_13, %c384], %15 {strides = array<i32>} : memref<4x512xf32, #tpu.memory_space<vmem>>, vector<4x128xf32>,
    %c0_14 = arith.constant 0 : index
    %c128 = arith.constant 128 : index
    %17 = vector.load %arg7[%c0_14, %c128] : memref<4x512xf32, #tpu.memory_space<vmem>>, vector<4x256xf32>
    tpu.vector_store %arg7[%c0_14, %c128], %12 {strides = array<i32>} : memref<4x512xf32, #tpu.memory_space<vmem>>, vector<4x256xf32>,
    %c0_15 = arith.constant 0 : index
    %c0_16 = arith.constant 0 : index
    %18 = vector.load %arg5[%c0_15, %c0_16] : memref<1x256xi32, #tpu.memory_space<vmem>>, vector<1x256xi32>
    %c0_i32 = arith.constant 0 : i32
    %19 = vector.broadcast %c0_i32 : i32 to vector<1x256xi32>
    %20 = arith.cmpi sgt, %18, %19 : vector<1x256xi32>
    %c15_i32 = arith.constant 15 : i32
    %21 = vector.broadcast %c15_i32 : i32 to vector<1x256xi32>
    %22 = arith.cmpi slt, %18, %21 : vector<1x256xi32>
    %c0_17 = arith.constant 0 : index
    %c111 = arith.constant 111 : index
    %23 = vector.load %arg7[%c0_17, %c111] : memref<4x512xf32, #tpu.memory_space<vmem>>, vector<4x256xf32>
    %cst_18 = arith.constant 0.000000e+00 : f32
    %24 = vector.broadcast %cst_18 : f32 to vector<4x256xf32>
    %25 = vector.shape_cast %20 : vector<1x256xi1> to vector<1x256xi1>
    %26 = vector.broadcast %25 : vector<1x256xi1> to vector<4x256xi1>
    %27 = arith.select %26, %23, %24 : vector<4x256xi1>, vector<4x256xf32>
    %c0_19 = arith.constant 0 : index
    %c0_20 = arith.constant 0 : index
    %28 = vector.load %arg8[%c0_19, %c0_20] : memref<36x256xf32, #tpu.memory_space<vmem>>, vector<4x256xf32>
    tpu.vector_store %arg8[%c0_19, %c0_20], %27 {strides = array<i32>} : memref<36x256xf32, #tpu.memory_space<vmem>>, vector<4x256xf32>,
    %c0_21 = arith.constant 0 : index
    %c112 = arith.constant 112 : index
    %29 = vector.load %arg7[%c0_21, %c112] : memref<4x512xf32, #tpu.memory_space<vmem>>, vector<4x256xf32>
    %c4 = arith.constant 4 : index
    %c0_22 = arith.constant 0 : index
    %30 = vector.load %arg8[%c4, %c0_22] : memref<36x256xf32, #tpu.memory_space<vmem>>, vector<4x256xf32>
    tpu.vector_store %arg8[%c4, %c0_22], %29 {strides = array<i32>} : memref<36x256xf32, #tpu.memory_space<vmem>>, vector<4x256xf32>,
    %c0_23 = arith.constant 0 : index
    %c113 = arith.constant 113 : index
    %31 = vector.load %arg7[%c0_23, %c113] : memref<4x512xf32, #tpu.memory_space<vmem>>, vector<4x256xf32>
    %cst_24 = arith.constant 0.000000e+00 : f32
    %32 = vector.broadcast %cst_24 : f32 to vector<4x256xf32>
    %33 = vector.shape_cast %22 : vector<1x256xi1> to vector<1x256xi1>
    %34 = vector.broadcast %33 : vector<1x256xi1> to vector<4x256xi1>
    %35 = arith.select %34, %31, %32 : vector<4x256xi1>, vector<4x256xf32>
    %c8 = arith.constant 8 : index
    %c0_25 = arith.constant 0 : index
    %36 = vector.load %arg8[%c8, %c0_25] : memref<36x256xf32, #tpu.memory_space<vmem>>, vector<4x256xf32>
    tpu.vector_store %arg8[%c8, %c0_25], %35 {strides = array<i32>} : memref<36x256xf32, #tpu.memory_space<vmem>>, vector<4x256xf32>,
    %c0_26 = arith.constant 0 : index
    %c127 = arith.constant 127 : index
    %37 = vector.load %arg7[%c0_26, %c127] : memref<4x512xf32, #tpu.memory_space<vmem>>, vector<4x256xf32>
    %cst_27 = arith.constant 0.000000e+00 : f32
    %38 = vector.broadcast %cst_27 : f32 to vector<4x256xf32>
    %39 = vector.shape_cast %20 : vector<1x256xi1> to vector<1x256xi1>
    %40 = vector.broadcast %39 : vector<1x256xi1> to vector<4x256xi1>
    %41 = arith.select %40, %37, %38 : vector<4x256xi1>, vector<4x256xf32>
    %c12 = arith.constant 12 : index
    %c0_28 = arith.constant 0 : index
    %42 = vector.load %arg8[%c12, %c0_28] : memref<36x256xf32, #tpu.memory_space<vmem>>, vector<4x256xf32>
    tpu.vector_store %arg8[%c12, %c0_28], %41 {strides = array<i32>} : memref<36x256xf32, #tpu.memory_space<vmem>>, vector<4x256xf32>,
    %c0_29 = arith.constant 0 : index
    %c128_30 = arith.constant 128 : index
    %43 = vector.load %arg7[%c0_29, %c128_30] : memref<4x512xf32, #tpu.memory_space<vmem>>, vector<4x256xf32>
    %c16 = arith.constant 16 : index
    %c0_31 = arith.constant 0 : index
    %44 = vector.load %arg8[%c16, %c0_31] : memref<36x256xf32, #tpu.memory_space<vmem>>, vector<4x256xf32>
    tpu.vector_store %arg8[%c16, %c0_31], %43 {strides = array<i32>} : memref<36x256xf32, #tpu.memory_space<vmem>>, vector<4x256xf32>,
    %c0_32 = arith.constant 0 : index
    %c129 = arith.constant 129 : index
    %45 = vector.load %arg7[%c0_32, %c129] : memref<4x512xf32, #tpu.memory_space<vmem>>, vector<4x256xf32>
    %cst_33 = arith.constant 0.000000e+00 : f32
    %46 = vector.broadcast %cst_33 : f32 to vector<4x256xf32>
    %47 = vector.shape_cast %22 : vector<1x256xi1> to vector<1x256xi1>
    %48 = vector.broadcast %47 : vector<1x256xi1> to vector<4x256xi1>
    %49 = arith.select %48, %45, %46 : vector<4x256xi1>, vector<4x256xf32>
    %c20 = arith.constant 20 : index
    %c0_34 = arith.constant 0 : index
    %50 = vector.load %arg8[%c20, %c0_34] : memref<36x256xf32, #tpu.memory_space<vmem>>, vector<4x256xf32>
    tpu.vector_store %arg8[%c20, %c0_34], %49 {strides = array<i32>} : memref<36x256xf32, #tpu.memory_space<vmem>>, vector<4x256xf32>,
    %c0_35 = arith.constant 0 : index
    %c143 = arith.constant 143 : index
    %51 = vector.load %arg7[%c0_35, %c143] : memref<4x512xf32, #tpu.memory_space<vmem>>, vector<4x256xf32>
    %cst_36 = arith.constant 0.000000e+00 : f32
    %52 = vector.broadcast %cst_36 : f32 to vector<4x256xf32>
    %53 = vector.shape_cast %20 : vector<1x256xi1> to vector<1x256xi1>
    %54 = vector.broadcast %53 : vector<1x256xi1> to vector<4x256xi1>
    %55 = arith.select %54, %51, %52 : vector<4x256xi1>, vector<4x256xf32>
    %c24 = arith.constant 24 : index
    %c0_37 = arith.constant 0 : index
    %56 = vector.load %arg8[%c24, %c0_37] : memref<36x256xf32, #tpu.memory_space<vmem>>, vector<4x256xf32>
    tpu.vector_store %arg8[%c24, %c0_37], %55 {strides = array<i32>} : memref<36x256xf32, #tpu.memory_space<vmem>>, vector<4x256xf32>,
    %c0_38 = arith.constant 0 : index
    %c144 = arith.constant 144 : index
    %57 = vector.load %arg7[%c0_38, %c144] : memref<4x512xf32, #tpu.memory_space<vmem>>, vector<4x256xf32>
    %c28 = arith.constant 28 : index
    %c0_39 = arith.constant 0 : index
    %58 = vector.load %arg8[%c28, %c0_39] : memref<36x256xf32, #tpu.memory_space<vmem>>, vector<4x256xf32>
    tpu.vector_store %arg8[%c28, %c0_39], %57 {strides = array<i32>} : memref<36x256xf32, #tpu.memory_space<vmem>>, vector<4x256xf32>,
    %c0_40 = arith.constant 0 : index
    %c145 = arith.constant 145 : index
    %59 = vector.load %arg7[%c0_40, %c145] : memref<4x512xf32, #tpu.memory_space<vmem>>, vector<4x256xf32>
    %cst_41 = arith.constant 0.000000e+00 : f32
    %60 = vector.broadcast %cst_41 : f32 to vector<4x256xf32>
    %61 = vector.shape_cast %22 : vector<1x256xi1> to vector<1x256xi1>
    %62 = vector.broadcast %61 : vector<1x256xi1> to vector<4x256xi1>
    %63 = arith.select %62, %59, %60 : vector<4x256xi1>, vector<4x256xf32>
    %c32 = arith.constant 32 : index
    %c0_42 = arith.constant 0 : index
    %64 = vector.load %arg8[%c32, %c0_42] : memref<36x256xf32, #tpu.memory_space<vmem>>, vector<4x256xf32>
    tpu.vector_store %arg8[%c32, %c0_42], %63 {strides = array<i32>} : memref<36x256xf32, #tpu.memory_space<vmem>>, vector<4x256xf32>,
    %c0_43 = arith.constant 0 : index
    %c0_44 = arith.constant 0 : index
    %65 = vector.load %arg2[%c0_43, %c0_44] : memref<8x36xf32, #tpu.memory_space<vmem>>, vector<8x36xf32>
    %c0_45 = arith.constant 0 : index
    %c0_46 = arith.constant 0 : index
    %66 = vector.load %arg8[%c0_45, %c0_46] : memref<36x256xf32, #tpu.memory_space<vmem>>, vector<36x256xf32>
    %cst_47 = arith.constant dense<0.000000e+00> : vector<8x256xf32>
    %67 = tpu.matmul %65, %66, %cst_47 {dimension_numbers = #tpu.dot_dimension_numbers<[1], [0], [0], [1], [0, 0, 1, 1], [], []>} : vector<8x36xf32>, vector<36x256xf32>, vector<8x256xf32> -> vector<8x256xf32>
    %c0_48 = arith.constant 0 : index
    %c4_49 = arith.constant 4 : index
    %c0_50 = arith.constant 0 : index
    %68 = vector.load %arg6[%c0_48, %c4_49, %c0_50] : memref<1x12x256xf32, #tpu.memory_space<vmem>>, vector<1x8x256xf32>
    %69 = vector.shape_cast %68 : vector<1x8x256xf32> to vector<8x256xf32>
    %70 = vector.shape_cast %67 : vector<8x256xf32> to vector<1x8x256xf32>
    tpu.vector_store %arg6[%c0_48, %c4_49, %c0_50], %70 {strides = array<i32>} : memref<1x12x256xf32, #tpu.memory_space<vmem>>, vector<1x8x256xf32>,
    return
  }
  func.func @transform_0(%arg0: i32) -> (i32, i32, i32) {
    %c0_i32 = arith.constant 0 : i32
    %c0_i32_0 = arith.constant 0 : i32
    %c0_i32_1 = arith.constant 0 : i32
    return %arg0, %c0_i32, %c0_i32_0 : i32, i32, i32
  }
  func.func @transform_1(%arg0: i32) -> (i32, i32) {
    %c0_i32 = arith.constant 0 : i32
    %c0_i32_0 = arith.constant 0 : i32
    %c0_i32_1 = arith.constant 0 : i32
    return %c0_i32, %c0_i32_0 : i32, i32
  }
  func.func @transform_2(%arg0: i32) -> (i32, i32) {
    %c0_i32 = arith.constant 0 : i32
    %c0_i32_0 = arith.constant 0 : i32
    %c0_i32_1 = arith.constant 0 : i32
    return %c0_i32, %c0_i32_0 : i32, i32
  }
  func.func @transform_3(%arg0: i32) -> (i32, i32) {
    %c0_i32 = arith.constant 0 : i32
    %c0_i32_0 = arith.constant 0 : i32
    %c0_i32_1 = arith.constant 0 : i32
    return %c0_i32, %c0_i32_0 : i32, i32
  }
  func.func @transform_4(%arg0: i32) -> (i32, i32) {
    %c0_i32 = arith.constant 0 : i32
    %c0_i32_0 = arith.constant 0 : i32
    %c0_i32_1 = arith.constant 0 : i32
    return %c0_i32, %c0_i32_0 : i32, i32
  }
  func.func @transform_5(%arg0: i32) -> (i32, i32, i32) {
    %c0_i32 = arith.constant 0 : i32
    %c0_i32_0 = arith.constant 0 : i32
    %c0_i32_1 = arith.constant 0 : i32
    return %arg0, %c0_i32, %c0_i32_0 : i32, i32, i32
  }
}

</mosaic_0001>

<bundles_post_ra>
// kernel: tpu_custom_call.1
= control target key start
LH: loop header
LB: loop body
LE: loop exit
PB: predicated region body
PF: predicated region fallthrough
CT: control target
= control target key end

     0   :  { %10 = vsyncpa [#allocation5], 0  ;;  %s1017_s0 = inlined_call_operand.hbm [shape: f32[2,4,256], index: 0, kind: input, shape index: {}]   ;;  %s1018_s1 = inlined_call_operand.vmem [shape: f32[8,36], index: 1, kind: input, shape index: {}]   ;;  %s1019_s2 = inlined_call_operand.vmem [shape: f32[4,1], index: 2, kind: input, shape index: {}]   ;;  %s1020_s3 = inlined_call_operand.vmem [shape: f32[4,1], index: 3, kind: input, shape index: {}]   ;;  %s1021_s4 = inlined_call_operand.vmem [shape: s32[1,256], index: 4, kind: input, shape index: {}]   ;;  %s1022_s5 = inlined_call_operand.vmem [shape: f32[2,12,256], index: 5, kind: output, shape index: {}]  }
   0x1   :  { %12 = vsyncpa [#allocation5 + $0x1], 0  ;;  %s831_s18 = smov 0   ;;  %s833_s19 = smov 0  }
   0x2   :  { %s835_s20 = smov 0   ;;  %s837_s21 = smov 0  }
   0x3 LB: > { %s850_s22 = sadd.s32 4294967295, %s787_s21   ;;  %s853_s23 = sadd.s32 1, %s787_s21   ;;  %s787_s21 = sphi %s837_s21, %s1032_s21   ;;  %s783_s20 = sphi %s835_s20, %s1031_s20   ;;  %s779_s19 = sphi %s833_s19, %s1030_s19   ;;  %s775_s18 = sphi %s831_s18, %s1029_s18  }
   0x4   : > { %s22_s24 = ssub.s32 %s787_s21, %s853_s23  ;;  %s25_s25 = sadd.s32 1, %s783_s20 }
   0x5   : > { %p23_p0 = scmp.eq.s32.totalorder %s22_s24, 0  ;;  %p32_p1 = scmp.ne.s32.totalorder %s783_s20, %s779_s19 }
   0x6   : > { %p33_p2 = scmp.eq.s32.totalorder %s787_s21, 0  ;;  %p38_p3 = scmp.ne.s32.totalorder %s779_s19, %s775_s18 }
   0x7   : > { %s863_s26 = scalar_select %p23_p0, %s783_s20, %s25_s25  }
   0x8   : > { %p34_p4 = por %p33_p2, %p32_p1  ;;  %p39_p5 = scmp.eq.s32.totalorder %s850_s22, 0 }
   0x9   : > { %p675_p6 = scmp.lt.s32.totalorder %s787_s21, 2  ;;  %s184_s28 = sand.u32 1, %s783_s20  }
   0xa   : > { %p867_p7 = por %p39_p5, %p38_p3  ;;  %s655_s29 = sshll.u32 %s184_s28, 3 }
   0xb   : > { %s667_s30 = sshll.u32 %s787_s21, 7  ;;  %s188_s9 = scalar_lea.vmem [#allocation4], %s655_s29 }
   0xc   : > { %s1024_s27 = scalar_select %p867_p7, 1, 0 }
   0xd   : > { %s876_s8 = scalar_lea.hbm %s1017_s0, %s667_s30  ;;  %s196_s10 = sshll.u32 %s188_s9, 4  ;;  %s878_s10 = int_to_ptr.vmem [resolvable:$true] %s196_s10 }
   0xe   : > { %p880_p8 = pnand %p675_p6, %p34_p4  ;;  %s185_s12 = scalar_lea.sflag [#allocation5], %s184_s28 }
   0xf   : > { %s725_s13 = scalar_lea.hbm %s876_s8, 128  ;;  %s730_s16 = scalar_lea.hbm %s1017_s0, 256 }
  0x10   : > { %p726_p11 = scmp.ne.s32.totalorder %s876_s8, %s725_s13  ;;  %p727_p12 = pneg %p880_p8 }
  0x11   : > { %p731_p1 = scmp.lt.s32.totalorder %s876_s8, %s1017_s0  ;;  %p732_p2 = scmp.lt.s32.totalorder %s730_s16, %s725_s13 }
  0x12   : > { %p728_p13 = pnand %p727_p12, %p726_p11 }
  0x13   : > { %p733_p3 = por %p732_p2, %p731_p1 }
  0x14   : > { %p729_p0 = pneg %p728_p13 }
  0x16   : > { %p734_p4 = pnand %p733_p3, %p729_p0 }
  0x18   : > { %737 = shalt.err (!%p734_p4)
}
  0x19   : > { %s738_s24 = scalar_lea.vmem %s878_s10, 128  ;;  %s789_s25 = smov [#allocation4]  }
  0x1a   : > { %p739_p5 = scmp.ne.s32.totalorder %s878_s10, %s738_s24  ;;  %s743_s28 = sshll.u32 %s789_s25, 4  ;;  %s744_s28 = int_to_ptr.vmem [resolvable:$false] %s743_s28 }
  0x1b   : > { %s745_s29 = scalar_lea.vmem %s744_s28, 256  ;;  %p746_p13 = scmp.lt.s32.totalorder %s878_s10, %s744_s28 }
  0x1c   : > { %p741_p6 = pnand %p739_p5, %p727_p12  ;;  %p747_p9 = scmp.lt.s32.totalorder %s745_s29, %s738_s24 }
  0x1e   : > { %p742_p11 = pneg %p741_p6  ;;  %p748_p10 = por %p747_p9, %p746_p13 }
  0x20   : > { %p749_p7 = pnand %p748_p10, %p742_p11 }
  0x22   : > { %752 = shalt.err (!%p749_p7)
}
  0x23   : > { %674 = dma.hbm_to_vmem [thread:$0]  (!%p880_p8), %s876_s8, 128, %s878_s10, %s185_s12  }
  0x24   : > { %p1026_p0 = scmp.lt.s32.totalorder %s787_s21, 3  ;;  %p1027_p1 = scmp.ge.s32.totalorder %s787_s21, 1 }
  0x26   : > { %p202_p12 = pnand %p1027_p1, %p1026_p0 }
  0x27   : > { %s207_s30 = sand.u32 (!%p202_p12), 1, %s779_s19   ;;  %p1028_p9 = scmp.ne.s32.totalorder (!%p202_p12), %s1024_s27, 0 }
  0x28   : > { %205 = sbr.rel (%p202_p12) target bundleno = 549 (0x225), region = 40  ;;  %s659_s6 = sshll.u32 (!%p202_p12), %s207_s30, 3 }
  0x29   : > { %s208_s7 = scalar_lea.sflag (!%p202_p12), [#allocation5], %s207_s30  ;;  %s211_s9 = scalar_lea.vmem (!%p202_p12), [#allocation4], %s659_s6 }
  0x2d   : > { %770 = dma.done.wait (%p1028_p9), %s208_s7, 128  }
  0x2e   : > { %772 = vsyncadd (%p1028_p9), %s208_s7, 4294967168  ;;  %v257_v0 = vlaneseq  ;;  %p238_p7 = scmp.lt.s32.totalorder %s850_s22, 1  ;;  %v790_v1 = vmov 0   ;;  %v791_v2 = vmov 0.0   ;;  %v281_v6 = vld [vmem:[%s1021_s4] sm:$0x3] }
  0x2f   : > { %719 = vset.pattern.permute.xlu0 %v790_v1  ;;  %279 = vst [vmem:[#allocation2 + $0xc] sm:$0xf] %v791_v2  ;;  %278 = vst [vmem:[#allocation2] sm:$0xf] %v791_v2  ;;  %568 = vmatprep.mubr.f32.mxu0 %v791_v2  ;;  %v249_v7 = vld [vmem:[%s1019_s2] sm:$0xf] }
  0x30   : > { %s1034_s22 = smov (!%p238_p7, %s850_s22), 1  ;;  %v258_v3 = vshrl.u32 %v257_v0, 7  ;;  %vm282_vm0 = vcmp.gt.s32.totalorder %v281_v6, 0  ;;  %vm283_vm1 = vcmp.lt.s32.totalorder %v281_v6, 15  ;;  %252 = vperm.xlu0 %719, %v249_v7   ;;  %v243_v8 = vld [vmem:[%s211_s9] sm:$0xff]  ;;  %s792_s16 = smov 111  }
  0x31   : > { %s668_s21 = sshll.u32 %s1034_s22, 5  ;;  %v286_v9 = vsel %vm282_vm0, 1, %v790_v1  ;;  %v336_v10 = vsel %vm283_vm1, 1, %v790_v1  ;;  %v263_v11 = vld [vmem:[%s1020_s3] sm:$0xf]  ;;  %v245_v12 = vcombine.high %v243_v8, %v243_v8  ;;  %s793_s17 = smov 127  }
  0x32   : > { %v289_v4 = vsub.s32 0, %v258_v3  ;;  %v293_v5 = vsub.s32 1, %v258_v3  ;;  %s924_s14 = scalar_lea.vmem %s1022_s5, %s668_s21  ;;  %s794_s18 = smov 113   ;;  %v796_v21 = vmov 839922192   ;;  %vm455_vm2 = vcmask 916480  }
  0x33   : > { %247 = vst [vmem:[%s924_s14] sm:$0xf] %v243_v8  ;;  %248 = vst [vmem:[%s924_s14 + $0x8] sm:$0xf] %v245_v12  ;;  %s795_s24 = smov 112   ;;  %v255_v22 = vunpack.c.l.s4 %v796_v21  ;;  %s797_s25 = smov 1   ;;  %vm473_vm3 = vcmask 908288  }
  0x34   : > { %v930_v14 = vrot.slane %v286_v9, %v289_v4  ;;  %v932_v15 = vrot.slane %v286_v9, %v293_v5  ;;  %v934_v16 = vrot.slane %v336_v10, %v289_v4  ;;  %v936_v17 = vrot.slane %v336_v10, %v293_v5  ;;  %266 = vperm.xlu0 %719, %v263_v11   ;;  %s798_s28 = smov 15   ;;  %s799_s29 = smov 17  }
  0x35   : > { %v256_v23 = vunpack.c.0.s8 %v255_v22  ;;  %s800_s30 = smov 16   ;;  %vm408_vm6 = vcmask 1039360   ;;  %vm306_vm7 = vcmask 138240   ;;  %vm434_vm10 = vcmask 924672  }
  0x36   : > { %v463_v13 = vld [vmem:[#allocation2 + $0xc] sm:$0xf]  ;;  %vm345_vm4 = vcmp.eq.s32.totalorder %v934_v16, 1  ;;  %vm346_vm5 = vcmp.eq.s32.totalorder %v936_v17, 1  ;;  %vm295_vm8 = vcmp.eq.s32.totalorder %v930_v14, 1  ;;  %vm296_vm9 = vcmp.eq.s32.totalorder %v932_v15, 1 }
  0x37   : > { %471 = vrot.lane.b32.xlu1 %v463_v13, %s792_s16  ;;  %v398_v18 = vld [vmem:[#allocation2 + $0xc] sm:$0xf]  ;;  %v259_v24 = vsub.s32 %v256_v23, %v258_v3  ;;  %vm327_vm11 = vcmask 130048   ;;  %vm497_vm12 = vcmask 1043456   ;;  %vm376_vm13 = vcmask 7168  }
  0x38   : > { %406 = vrot.lane.b32.xlu0 %v398_v18, %s793_s17  ;;  %v424_v19 = vld [vmem:[#allocation2 + $0xc] sm:$0xf]  ;;  %vm356_vm14 = vcmask 121856   ;;  %vm493_vm15 = vcmask 293888  }
  0x39   : > { %v721_v20 = vld [vmem:[#allocation2 + $0xc] ss:$0 sps:$4 sm:$0xff]  }
  0x3c   : > { %432 = vrot.lane.b32.xlu0 %v424_v19, %s794_s18 }
  0x40   : > { %453 = vrot.lane.b32.xlu0 %v721_v20, %s795_s24 }
  0xa9   : > { %v472_v43 = vpop.permute.xlu1 %471 }
  0xab   : > { %v253_v25 = vpop.permute.xlu0 %252 }
  0xac   : > { %v260_v26 = vrot.slane %v253_v25, %v259_v24 }
  0xae   : > { %v262_v28 = vmul.f32 %v260_v26, %v243_v8 }
  0xaf   : > { %v267_v27 = vpop.permute.xlu0 %266 }
  0xb0   : > { %v274_v29 = vrot.slane %v267_v27, %v259_v24 }
  0xb2   : > { %v276_v30 = vadd.f32 %v274_v29, %v262_v28 }
  0xb3   : > { %v407_v41 = vpop.permute.xlu0 %406 }
  0xb4   : > { %v277_v31 = vmax.f32 %v276_v30, 0.0 }
  0xb6   : > { %280 = vst [vmem:[#allocation2 + $0x4] sm:$0xff] %v277_v31  ;;  %467 = vrot.lane.b32.xlu0 %v277_v31, %s792_s16  ;;  %v466_v32 = vcombine.high %v277_v31, %v277_v31  ;;  %402 = vrot.lane.b32.xlu1 %v277_v31, %s793_s17  ;;  %395 = vst [vmem:[#allocation3 + $0x48] sm:$0xf] %v277_v31  ;;  %v447_v39 = vcombine.low %v277_v31, %v277_v31 }
  0xb7   : > { %v433_v42 = vpop.permute.xlu0 %432 }
  0xb8   : > { %396 = vst [vmem:[#allocation3 + $0x28] sm:$0xf] %v466_v32 }
  0xba   : > { %428 = vrot.lane.b32.xlu0 %v277_v31, %s794_s18  ;;  %451 = vrot.lane.b32.xlu1 %v277_v31, %s795_s24 }
  0xbb   : > { %v454_v44 = vpop.permute.xlu0 %453 }
  0xbd   : > { %v366_v33 = vld [vmem:[#allocation2 + $0x8] sm:$0xf]  ;;  %v334_v34 = vld [vmem:[#allocation2] sm:$0xff] }
  0xbe   : > { %374 = vrot.lane.b32.xlu0 %v366_v33, %s797_s25  ;;  %350 = vrot.lane.b32.xlu1 %v334_v34, %s798_s28  ;;  %v285_v35 = vld [vmem:[#allocation2 + $0x8] sm:$0xf]  ;;  %v349_v37 = vcombine.high %v334_v34, %v334_v34  ;;  %v319_v40 = vcombine.low %v334_v34, %v334_v34 }
  0xbf   : > { %v335_v36 = vld [vmem:[#allocation2 + $0x8] sm:$0xf] }
  0xc0   : > { %v724_v38 = vld [vmem:[#allocation2 + $0x8] ss:$0 sps:$4 sm:$0xff]  }
  0xc2   : > { %370 = vrot.lane.b32.xlu0 %v334_v34, %s797_s25  ;;  %304 = vrot.lane.b32.xlu1 %v285_v35, %s799_s29 }
  0xc6   : > { %354 = vrot.lane.b32.xlu0 %v335_v36, %s798_s28  ;;  %323 = vrot.lane.b32.xlu1 %v334_v34, %s800_s30 }
  0xca   : > { %469 = vrot.lane.b32.xlu1 %v466_v32, %s792_s16  ;;  %300 = vrot.lane.b32.xlu0 %v334_v34, %s799_s29 }
  0xce   : > { %404 = vrot.lane.b32.xlu1 %v466_v32, %s793_s17  ;;  %302 = vrot.lane.b32.xlu0 %v349_v37, %s799_s29 }
  0xd2   : > { %430 = vrot.lane.b32.xlu1 %v466_v32, %s794_s18  ;;  %325 = vrot.lane.b32.xlu0 %v724_v38, %s800_s30 }
  0xd6   : > { %372 = vrot.lane.b32.xlu1 %v349_v37, %s797_s25 }
  0xda   : > { %449 = vrot.lane.b32.xlu1 %v447_v39, %s795_s24 }
  0xde   : > { %352 = vrot.lane.b32.xlu1 %v349_v37, %s798_s28 }
  0xe2   : > { %321 = vrot.lane.b32.xlu1 %v319_v40, %s800_s30 }
 0x128   : > { %v468_v45 = vpop.permute.xlu0 %467  ;;  %v403_v46 = vpop.permute.xlu1 %402 }
 0x12c   : > { %v429_v47 = vpop.permute.xlu0 %428  ;;  %v951_v48 = vpop.permute.xlu1 %451 }
 0x12d   : > { %v457_v49 = vsel %vm455_vm2, %v951_v48, %v454_v44 }
 0x12e   : > { %461 = vst [vmem:[#allocation3 + $0x20] sm:$0xf0] %v457_v49 }
 0x130   : > { %v375_v50 = vpop.permute.xlu0 %374  ;;  %v955_v51 = vpop.permute.xlu1 %350 }
 0x134   : > { %v371_v52 = vpop.permute.xlu0 %370  ;;  %v305_v53 = vpop.permute.xlu1 %304 }
 0x138   : > { %v957_v54 = vpop.permute.xlu0 %354  ;;  %v959_v55 = vpop.permute.xlu1 %323 }
 0x13c   : > { %v470_v56 = vpop.permute.xlu1 %469  ;;  %v301_v57 = vpop.permute.xlu0 %300 }
 0x13d   : > { %v474_v58 = vsel %vm473_vm3, %v468_v45, %v470_v56  ;;  %v475_v59 = vsel %vm473_vm3, %v470_v56, %v472_v43 }
 0x13e   : > { %v478_v60 = vsel %vm345_vm4, %v474_v58, 0.0  ;;  %v479_v61 = vsel %vm346_vm5, %v475_v59, 0.0 }
 0x13f   : > { %480 = vst [vmem:[#allocation3 + $0x40] sm:$0xf] %v478_v60  ;;  %481 = vst [vmem:[#allocation3 + $0x38] sm:$0xf] %v479_v61 }
 0x140   : > { %v405_v62 = vpop.permute.xlu1 %404  ;;  %v303_v63 = vpop.permute.xlu0 %302 }
 0x141   : > { %v409_v0 = vsel %vm408_vm6, %v403_v46, %v405_v62  ;;  %v410_v1 = vsel %vm408_vm6, %v405_v62, %v407_v41  ;;  %v307_v2 = vsel %vm306_vm7, %v301_v57, %v303_v63  ;;  %v308_v3 = vsel %vm306_vm7, %v303_v63, %v305_v53 }
 0x142   : > { %v413_v4 = vsel %vm345_vm4, %v409_v0, 0.0  ;;  %v414_v5 = vsel %vm346_vm5, %v410_v1, 0.0  ;;  %v311_v6 = vsel %vm295_vm8, %v307_v2, 0.0  ;;  %v312_v7 = vsel %vm296_vm9, %v308_v3, 0.0 }
 0x143   : > { %v417_v8 = vrot.slane %v413_v4, 4  ;;  %v418_v9 = vrot.slane %v414_v5, 4  ;;  %313 = vst [vmem:[#allocation3 + $0x30] sm:$0xf] %v311_v6  ;;  %314 = vst [vmem:[#allocation3] sm:$0xf] %v312_v7 }
 0x144   : > { %v431_v10 = vpop.permute.xlu1 %430  ;;  %v326_v11 = vpop.permute.xlu0 %325 }
 0x145   : > { %421 = vst [vmem:[#allocation3 + $0x48] sm:$0xf0] %v417_v8  ;;  %422 = vst [vmem:[#allocation3 + $0x28] sm:$0xf0] %v418_v9  ;;  %v435_v12 = vsel %vm434_vm10, %v429_v47, %v431_v10  ;;  %v436_v13 = vsel %vm434_vm10, %v431_v10, %v433_v42  ;;  %v329_v18 = vsel %vm327_vm11, %v959_v55, %v326_v11  ;;  %v482_v42 = vld [vmem:[%s1018_s1] sm:$0xff] }
 0x146   : > { %v439_v19 = vsel %vm295_vm8, %v435_v12, 0.0  ;;  %v440_v20 = vsel %vm296_vm9, %v436_v13, 0.0  ;;  %333 = vst [vmem:[#allocation3] sm:$0xf0] %v329_v18  ;;  %v492_v21 = vld [vmem:[#allocation3 + $0x38] sm:$0xf] }
 0x147   : > { %v491_v22 = vld [vmem:[#allocation3 + $0x40] sm:$0xf]  ;;  %441 = vst [vmem:[#allocation3 + $0x8] sm:$0xf] %v439_v19  ;;  %442 = vst [vmem:[#allocation3 + $0x20] sm:$0xf] %v440_v20  ;;  %662 = vmatprep.subr.msk.mxu0 %vm497_vm12, %v492_v21 }
 0x148   : > { %663 = vmatpush1.msk.msra.mxu0 %vm497_vm12, %v491_v22  ;;  %v373_v23 = vpop.permute.xlu1 %372 }
 0x149   : > { %v377_v24 = vsel %vm376_vm13, %v371_v52, %v373_v23  ;;  %v378_v25 = vsel %vm376_vm13, %v373_v23, %v375_v50 }
 0x14a   : > { %v381_v26 = vsel %vm295_vm8, %v377_v24, 0.0  ;;  %v382_v27 = vsel %vm296_vm9, %v378_v25, 0.0 }
 0x14b   : > { %v385_v28 = vrot.slane %v381_v26, 4  ;;  %v386_v29 = vrot.slane %v382_v27, 4 }
 0x14c   : > { %v450_v30 = vpop.permute.xlu1 %449  ;;  %v488_v39 = vld [vmem:[#allocation3 + $0x28] sm:$0xff] }
 0x14d   : > { %389 = vst [vmem:[#allocation3 + $0x18] sm:$0xf0] %v385_v28  ;;  %390 = vst [vmem:[#allocation3 + $0x10] sm:$0xf0] %v386_v29  ;;  %v456_v31 = vsel %vm455_vm2, %v450_v30, %v951_v48  ;;  %v487_v40 = vld [vmem:[#allocation3 + $0x48] sm:$0xff]  ;;  %v484_v17 = vld [vmem:[#allocation3] sm:$0xff] }
 0x14e   : > { %460 = vst [vmem:[#allocation3 + $0x8] sm:$0xf0] %v456_v31  ;;  %v490_v32 = vld [vmem:[#allocation3 + $0x20] sm:$0xff] }
 0x14f   : > { %528 = vmatprep.subr.mxu0 %v490_v32 }
 0x150   : > { %v353_v33 = vpop.permute.xlu1 %352 }
 0x151   : > { %v357_v34 = vsel %vm356_vm14, %v955_v51, %v353_v33  ;;  %v358_v14 = vsel %vm356_vm14, %v353_v33, %v957_v54 }
 0x152   : > { %v361_v15 = vsel %vm345_vm4, %v357_v34, 0.0  ;;  %v362_v35 = vsel %vm346_vm5, %v358_v14, 0.0 }
 0x153   : > { %363 = vst [vmem:[#allocation3 + $0x18] sm:$0xf] %v361_v15  ;;  %364 = vst [vmem:[#allocation3 + $0x10] sm:$0xf] %v362_v35 }
 0x154   : > { %v322_v36 = vpop.permute.xlu1 %321 }
 0x155   : > { %v328_v37 = vsel %vm327_vm11, %v322_v36, %v959_v55  ;;  %v489_v38 = vld [vmem:[#allocation3 + $0x8] sm:$0xff] }
 0x156   : > { %332 = vst [vmem:[#allocation3 + $0x30] sm:$0xf0] %v328_v37  ;;  %529 = vmatpush1.msra.mxu0 %v489_v38 }
 0x157   : > { %530 = vmatprep.subr.mxu0 %v488_v39 }
 0x158   : > { %531 = vmatpush1.msra.mxu0 %v487_v40 }
 0x15a   : > { %v486_v41 = vld [vmem:[#allocation3 + $0x10] sm:$0xff]  ;;  %v485_v16 = vld [vmem:[#allocation3 + $0x18] sm:$0xff] }
 0x15b   : > { %532 = vmatprep.subr.mxu0 %v486_v41 }
 0x15c   : > { %533 = vmatpush1.msra.mxu0 %v485_v16 }
 0x15d   : > { %534 = vmatprep.subr.mxu0 %v484_v17  ;;  %v483_v43 = vld [vmem:[#allocation3 + $0x30] sm:$0xff] }
 0x15e   : > { %535 = vmatpush1.msra.mxu0 %v483_v43 }
 0x15f   : > { %664 = vmatmul.mubr.msk.f32.vlgmr.msra.gmra.mxu0 %vm493_vm15, %v482_v42 }
 0x21f   : > { %v570_v44 = vpop.f32.mrf.mxu0 }
 0x220   : > { %v577_v45 = vrot.slane %v570_v44, 4 }
 0x221   : > { %v572_v46 = vpop.f32.mrf.mxu0 }
 0x222   : > { %581 = vst [vmem:[%s924_s14 + $0x10] ss:$-12 sps:$4 sm:$0xff] %v577_v45   ;;  %v578_v47 = vrot.slane %v572_v46, 4 }
 0x224   : > { %582 = vst [vmem:[%s924_s14 + $0x18] ss:$-12 sps:$4 sm:$0xff] %v578_v47  }
 0x225 PF: > { %p15_p8 = scmp.ge.s32.totalorder %s853_s23, 4   ;;  %s1029_s18 = smov %s779_s19 }
 0x226   : > { %s1030_s19 = smov %s783_s20  ;;  %s1031_s20 = smov %s863_s26 }
 0x227   : > { %s1032_s21 = smov %s853_s23  ;;  %17 = sbr.rel (!%p15_p8) target bundleno = 3 (0x3), region = 80 }
 0x22c   :  { %606 = vsyncpa [#allocation5], 1 }
 0x22d   :  { %608 = vsyncpa [#allocation5 + $0x1], 1 }

</bundles_post_ra>
